<compile_context>
chip_gen: v7x
topology: tpu7x:2x2x1
jax: 0.10.0
libtpu: 0.0.40
codegen_flags: <defaults>
</compile_context>

<pallas_src>
import jax
import jax.numpy as jnp
from jax.experimental import pallas as pl
from jax.experimental.pallas import tpu as pltpu


def _patch_embed_kernel(x_ref, w_ref, b_ref, o_ref):
    # x_ref: (TM, Kp) bf16 streamed patch tile
    # w_ref: (N,  Kp) bf16 resident projection weight (Conv2d (E, K) layout)
    # b_ref: (1,  N)  f32  resident bias
    # o_ref: (TM, N)  output tile (input dtype)
    acc = jax.lax.dot_general(
        x_ref[...], w_ref[...],
        dimension_numbers=(((1,), (1,)), ((), ())),   # x @ w.T on the MXU
        preferred_element_type=jnp.float32)
    o_ref[...] = (acc + b_ref[...]).astype(o_ref.dtype)


def patch_embed(x, weight, bias, patch_size, tile_m=512):
    """x: [B, C, H, W] (NCHW, like PyTorch). Returns [B, num_patches, embed_dim]."""
    B, C, H, W = x.shape
    ph, pw = patch_size
    assert H % ph == 0 and W % pw == 0
    gh, gw = H // ph, W // pw
    num_patches = gh * gw
    embed_dim = weight.shape[0]
    K = C * ph * pw
    M = B * num_patches

    # Patch extraction: NCHW -> (B, gh, gw, C, ph, pw) -> (M, K); flatten order
    # (c, kh, kw) matches the PyTorch Conv2d weight layout (E, C, ph, pw).
    # TODO(synk): with NHWC activations (and a (kh, kw, c) flatten order plus a
    # one-time weight re-layout at init) this transpose becomes a pure reshape.
    xp = x.reshape(B, C, gh, ph, gw, pw)
    xp = jnp.transpose(xp, (0, 2, 4, 1, 3, 5))
    xp = xp.reshape(M, K).astype(jnp.bfloat16)

    # Weight stays in Conv2d (E, K) layout (no transposed HBM copy); bf16 for
    # the MXU.  (In a production module the reshape/cast is hoisted to init.)
    w2 = weight.reshape(embed_dim, K).astype(jnp.bfloat16)
    b2 = bias.reshape(1, embed_dim).astype(jnp.float32)

    # Keep the contraction lane-dense: zero-pad K to a multiple of 128 (zeros
    # don't change the dot).  No-op for the module defaults (K = 512).
    Kp = ((K + 127) // 128) * 128
    if Kp != K:
        xp = jnp.pad(xp, ((0, 0), (0, Kp - K)))
        w2 = jnp.pad(w2, ((0, 0), (0, Kp - K)))

    # M tile: large (amortizes ~0.35 us per grid step, feeds the 256-wide MXU),
    # 16-row aligned for bf16 sublane packing.  The ragged last block (M not a
    # multiple of TM) is handled by Pallas with masked output stores, so there
    # is no M padding and no output slice.
    TM = max(16, min(tile_m, ((M + 15) // 16) * 16))
    grid_m = pl.cdiv(M, TM)

    out_itemsize = jnp.dtype(x.dtype).itemsize
    cost = pl.CostEstimate(
        flops=2 * M * Kp * embed_dim,
        transcendentals=0,
        bytes_accessed=(M * Kp * 2                      # bf16 patches
                        + embed_dim * Kp * 2            # bf16 weight
                        + M * embed_dim * out_itemsize  # output
                        + embed_dim * 4),               # f32 bias
    )

    out = pl.pallas_call(
        _patch_embed_kernel,
        out_shape=jax.ShapeDtypeStruct((M, embed_dim), x.dtype),
        grid=(grid_m,),
        in_specs=[
            pl.BlockSpec((TM, Kp), lambda i: (i, 0)),           # streamed patches
            pl.BlockSpec((embed_dim, Kp), lambda i: (0, 0)),    # resident weight
            pl.BlockSpec((1, embed_dim), lambda i: (0, 0)),     # resident bias
        ],
        out_specs=pl.BlockSpec((TM, embed_dim), lambda i: (i, 0)),
        compiler_params=pltpu.CompilerParams(
            # Patch tiles are independent: shard the grid across both TCs on
            # v7x (no-op on single-TC v5e/v6e).
            dimension_semantics=("parallel",),
            # Let the patch-extraction transpose fuse into this call's input
            # DMA instead of being a standalone HBM pass.
            allow_input_fusion=[True, False, False],
        ),
        cost_estimate=cost,
    )(xp, w2, b2)

    return out.reshape(B, num_patches, embed_dim)


if __name__ == "__main__":
    # Module defaults: img_size=12, patch_size=4, in_chans=32, embed_dim=256
    B, C, H, W = 2, 32, 12, 12
    patch = (4, 4)
    embed_dim = 256

    key = jax.random.PRNGKey(0)
    kx, kw, kb = jax.random.split(key, 3)

    x = jax.random.normal(kx, (B, C, H, W), dtype=jnp.float32)
    # Deterministic synthetic params (Conv2d shapes): weight (E, C, ph, pw), bias (E,)
    fan_in = C * patch[0] * patch[1]
    bound = 1.0 / jnp.sqrt(fan_in)
    weight = jax.random.uniform(kw, (embed_dim, C, patch[0], patch[1]),
                                minval=-bound, maxval=bound, dtype=jnp.float32)
    bias = jax.random.uniform(kb, (embed_dim,), minval=-bound, maxval=bound,
                              dtype=jnp.float32)

    out = patch_embed(x, weight, bias, patch)
    jax.block_until_ready(out)

    # Reference check against plain-JAX f32 conv (same semantics as PyTorch
    # Conv2d).  Tolerance accounts for the kernel's bf16 inputs (f32 accum).
    ref = jax.lax.conv_general_dilated(
        x, weight, window_strides=patch, padding="VALID",
        dimension_numbers=("NCHW", "OIHW", "NCHW"))
    ref = ref + bias[None, :, None, None]
    ref = ref.reshape(B, embed_dim, -1).transpose(0, 2, 1)
    assert out.shape == (B, (H // patch[0]) * (W // patch[1]), embed_dim)
    assert jnp.allclose(out, ref, atol=2e-2, rtol=2e-2)

    print("KERNEL_OK")
</pallas_src>

<mosaic_0001>
module attributes {stable_mosaic.version = 11 : i64} {
  func.func @_patch_embed_kernel(%arg0: i32, %arg1: memref<32x512xbf16, #tpu.memory_space<vmem>>, %arg2: memref<256x512xbf16, #tpu.memory_space<vmem>>, %arg3: memref<1x256xf32, #tpu.memory_space<vmem>>, %arg4: memref<32x256xf32, #tpu.memory_space<vmem>>) attributes {dimension_semantics = [#tpu.dimension_semantics<parallel>], iteration_bounds = array<i64: 1>, scalar_prefetch = 0 : i64, scratch_operands = 0 : i64, tpu.core_type = #tpu.core_type<tc>, window_params = [{transform_indices = @transform_0, window_bounds = array<i64: 32, 512>}, {pipeline_mode = #tpu.pipeline_mode<synchronous>, transform_indices = @transform_1, window_bounds = array<i64: 256, 512>}, {pipeline_mode = #tpu.pipeline_mode<synchronous>, transform_indices = @transform_2, window_bounds = array<i64: 1, 256>}, {transform_indices = @transform_3, window_bounds = array<i64: 32, 256>}]} {
    %c0 = arith.constant 0 : index
    %c0_0 = arith.constant 0 : index
    %0 = vector.load %arg1[%c0, %c0_0] : memref<32x512xbf16, #tpu.memory_space<vmem>>, vector<32x512xbf16>
    %c0_1 = arith.constant 0 : index
    %c0_2 = arith.constant 0 : index
    %1 = vector.load %arg2[%c0_1, %c0_2] : memref<256x512xbf16, #tpu.memory_space<vmem>>, vector<256x512xbf16>
    %cst = arith.constant dense<0.000000e+00> : vector<32x256xf32>
    %2 = tpu.matmul %0, %1, %cst {dimension_numbers = #tpu.dot_dimension_numbers<[1], [1], [0], [0], [0, 0, 1, 0], [], []>} : vector<32x512xbf16>, vector<256x512xbf16>, vector<32x256xf32> -> vector<32x256xf32>
    %c0_3 = arith.constant 0 : index
    %c0_4 = arith.constant 0 : index
    %3 = vector.load %arg3[%c0_3, %c0_4] : memref<1x256xf32, #tpu.memory_space<vmem>>, vector<1x256xf32>
    %4 = vector.broadcast %3 : vector<1x256xf32> to vector<32x256xf32>
    %5 = arith.addf %2, %4 : vector<32x256xf32>
    %c0_5 = arith.constant 0 : index
    %c0_6 = arith.constant 0 : index
    %6 = vector.load %arg4[%c0_5, %c0_6] : memref<32x256xf32, #tpu.memory_space<vmem>>, vector<32x256xf32>
    tpu.vector_store %arg4[%c0_5, %c0_6], %5 {strides = array<i32>} : memref<32x256xf32, #tpu.memory_space<vmem>>, vector<32x256xf32>,
    return
  }
  func.func @transform_0(%arg0: i32) -> (i32, i32) {
    %c0_i32 = arith.constant 0 : i32
    %c0_i32_0 = arith.constant 0 : i32
    return %arg0, %c0_i32 : i32, i32
  }
  func.func @transform_1(%arg0: i32) -> (i32, i32) {
    %c0_i32 = arith.constant 0 : i32
    %c0_i32_0 = arith.constant 0 : i32
    %c0_i32_1 = arith.constant 0 : i32
    return %c0_i32, %c0_i32_0 : i32, i32
  }
  func.func @transform_2(%arg0: i32) -> (i32, i32) {
    %c0_i32 = arith.constant 0 : i32
    %c0_i32_0 = arith.constant 0 : i32
    %c0_i32_1 = arith.constant 0 : i32
    return %c0_i32, %c0_i32_0 : i32, i32
  }
  func.func @transform_3(%arg0: i32) -> (i32, i32) {
    %c0_i32 = arith.constant 0 : i32
    %c0_i32_0 = arith.constant 0 : i32
    return %arg0, %c0_i32 : i32, i32
  }
}

</mosaic_0001>

<bundles_post_ra>
// kernel: tpu_custom_call.1
= control target key start
LH: loop header
LB: loop body
LE: loop exit
PB: predicated region body
PF: predicated region fallthrough
CT: control target
= control target key end

     0   :  { %8 = vsyncpa [#allocation3], 0  ;;  %s965_s0 = inlined_call_operand.hbm [shape: bf16[18,512], index: 0, kind: input, shape index: {}]   ;;  %s966_s1 = inlined_call_operand.hbm [shape: bf16[256,512], index: 1, kind: input, shape index: {}]   ;;  %s967_s2 = inlined_call_operand.vmem [shape: f32[1,256], index: 2, kind: input, shape index: {}]   ;;  %s968_s3 = inlined_call_operand.hbm [shape: f32[18,256], index: 3, kind: output, shape index: {}]  }
   0x1   :  { %9 = vsyncpa [#allocation6], 0 }
   0x2   :  { %10 = vsyncpa [#allocation4], 0 }
   0x3   :  { %15 = vsyncadd [#allocation3], 256  ;;  %s892_s12 = smov [#allocation2]   ;;  %s820_s16 = scalar_lea.hbm %s965_s0, 768 }
   0x4   :  { %s16_s13 = sshll.u32 %s892_s12, 4  ;;  %p821_p0 = scmp.ne.s32.totalorder %s965_s0, %s820_s16  ;;  %s17_s13 = int_to_ptr.vmem [resolvable:$true] %s16_s13 }
   0x5   :  { %p824_p1 = scmp.lt.u32.totalorder %s820_s16, %s965_s0 }
   0x7   :  { %p826_p2 = pnand %p824_p1, %p821_p0 }
   0x9   :  { %829 = shalt.err (!%p826_p2)
}
   0xa   :  { %s830_s21 = scalar_lea.vmem %s17_s13, 768  ;;  %s834_s22 = scalar_lea.vmem %s17_s13, 1024 }
   0xb   :  { %p831_p3 = scmp.ne.s32.totalorder %s17_s13, %s830_s21  ;;  %p835_p4 = scmp.lt.s32.totalorder %s17_s13, %s17_s13 }
   0xc   :  { %p836_p5 = scmp.lt.s32.totalorder %s834_s22, %s830_s21 }
   0xe   :  { %p837_p6 = por %p836_p5, %p835_p4 }
  0x10   :  { %p838_p7 = pnand %p837_p6, %p831_p3 }
  0x12   :  { %841 = shalt.err (!%p838_p7)
}
  0x13   :  { %s893_s23 = smov 256   ;;  %s894_s24 = smov 16  }
  0x14   :  { %22 = dma.hbm_to_vmem [thread:$0]  %s965_s0, 768, %s17_s13, [#allocation3], %s893_s23, %s893_s23, %s894_s24  }
  0x15   :  { %s895_s27 = smov [#allocation5]   ;;  %s842_s4 = scalar_lea.hbm %s966_s1, 8192 }
  0x16   :  { %s28_s28 = sshll.u32 %s895_s27, 4  ;;  %p843_p8 = scmp.ne.s32.totalorder %s966_s1, %s842_s4  ;;  %s29_s28 = int_to_ptr.vmem [resolvable:$true] %s28_s28 }
  0x17   :  { %p846_p9 = scmp.lt.u32.totalorder %s842_s4, %s966_s1 }
  0x19   :  { %p848_p10 = pnand %p846_p9, %p843_p8 }
  0x1b   :  { %851 = shalt.err (!%p848_p10)
}
  0x1c   :  { %s852_s9 = scalar_lea.vmem %s29_s28, 8192  ;;  %p857_p12 = scmp.lt.s32.totalorder %s29_s28, %s29_s28 }
  0x1d   :  { %p853_p11 = scmp.ne.s32.totalorder %s29_s28, %s852_s9  ;;  %p858_p13 = scmp.lt.s32.totalorder %s852_s9, %s852_s9 }
  0x1f   :  { %p859_p0 = por %p858_p13, %p857_p12 }
  0x21   :  { %p860_p1 = pnand %p859_p0, %p853_p11 }
  0x23   :  { %863 = shalt.err (!%p860_p1)
}
  0x24   :  { %34 = dma.hbm_to_vmem [thread:$0]  %s966_s1, 8192, %s29_s28, [#allocation6], %s893_s23, %s893_s23, %s894_s24  }
  0x25   :  { %886 = dma.done.wait [#allocation3], 1024  }
  0x26   :  { %887 = vsyncadd [#allocation3], 4294966272 }
  0x27   :  { %888 = dma.done.wait [#allocation6], 8192  }
  0x28   :  { %889 = vsyncadd [#allocation6], 4294959104  ;;  %v712_v0 = vld [vmem:[#allocation5 + $0x4] ss:$16 sps:$4 sm:$0xff]   ;;  %v714_v1 = vld [vmem:[#allocation5 + $0xc] ss:$16 sps:$4 sm:$0xff]  }
  0x29   :  { %487 = vmatprep.subr.bf16.mxu1 %v712_v0  ;;  %v716_v2 = vld [vmem:[#allocation5] ss:$16 sps:$4 sm:$0xff]   ;;  %v717_v3 = vld [vmem:[#allocation5 + $0x8] ss:$16 sps:$4 sm:$0xff]   ;;  %540 = vmatprep.subr.bf16.mxu0 %v714_v1  ;;  %v718_v4 = vld [vmem:[#allocation5 + $0x24] ss:$16 sps:$4 sm:$0xff]  }
  0x2a   :  { %488 = vmatpush1.bf16.xpose.msra.mxu1 %v716_v2  ;;  %541 = vmatpush1.bf16.xpose.msra.mxu0 %v717_v3  ;;  %v720_v5 = vld [vmem:[#allocation5 + $0x2c] ss:$16 sps:$4 sm:$0xff]   ;;  %v722_v6 = vld [vmem:[#allocation5 + $0x20] ss:$16 sps:$4 sm:$0xff]   ;;  %v723_v7 = vld [vmem:[#allocation5 + $0x28] ss:$16 sps:$4 sm:$0xff]  }
  0x2b   :  { %489 = vmatprep.subr.bf16.mxu1 %v718_v4  ;;  %542 = vmatprep.subr.bf16.mxu0 %v720_v5  ;;  %v724_v8 = vld [vmem:[#allocation5 + $0x44] ss:$16 sps:$4 sm:$0xff]   ;;  %v726_v9 = vld [vmem:[#allocation5 + $0x4c] ss:$16 sps:$4 sm:$0xff]   ;;  %v728_v10 = vld [vmem:[#allocation5 + $0x40] ss:$16 sps:$4 sm:$0xff]  }
  0x2c   :  { %v729_v11 = vld [vmem:[#allocation5 + $0x48] ss:$16 sps:$4 sm:$0xff]   ;;  %v730_v12 = vld [vmem:[#allocation5 + $0x64] ss:$16 sps:$4 sm:$0xff]   ;;  %v732_v13 = vld [vmem:[#allocation5 + $0x6c] ss:$16 sps:$4 sm:$0xff]  }
  0x2d   :  { %v734_v14 = vld [vmem:[#allocation5 + $0x60] ss:$16 sps:$4 sm:$0xff]   ;;  %v735_v15 = vld [vmem:[#allocation5 + $0x68] ss:$16 sps:$4 sm:$0xff]   ;;  %v736_v16 = vld [vmem:[#allocation5 + $0x84] ss:$16 sps:$4 sm:$0xff]  }
  0x2e   :  { %v738_v17 = vld [vmem:[#allocation5 + $0x8c] ss:$16 sps:$4 sm:$0xff]   ;;  %v740_v18 = vld [vmem:[#allocation5 + $0x80] ss:$16 sps:$4 sm:$0xff]   ;;  %v741_v19 = vld [vmem:[#allocation5 + $0x88] ss:$16 sps:$4 sm:$0xff]  }
  0x2f   :  { %v742_v20 = vld [vmem:[#allocation5 + $0xa4] ss:$16 sps:$4 sm:$0xff]   ;;  %v744_v21 = vld [vmem:[#allocation5 + $0xac] ss:$16 sps:$4 sm:$0xff]   ;;  %v746_v22 = vld [vmem:[#allocation5 + $0xa0] ss:$16 sps:$4 sm:$0xff]  }
  0x30   :  { %v747_v23 = vld [vmem:[#allocation5 + $0xa8] ss:$16 sps:$4 sm:$0xff]   ;;  %v748_v24 = vld [vmem:[#allocation5 + $0xc4] ss:$16 sps:$4 sm:$0xff]   ;;  %v750_v25 = vld [vmem:[#allocation5 + $0xcc] ss:$16 sps:$4 sm:$0xff]  }
  0x31   :  { %v810_v26 = vld [vmem:[#allocation2 + $0x4] ss:$16 sps:$4 sm:$0xff]   ;;  %v813_v27 = vld [vmem:[#allocation2 + $0xc] ss:$16 sps:$4 sm:$0xff]   ;;  %v752_v28 = vld [vmem:[#allocation5 + $0xc0] ss:$16 sps:$4 sm:$0xff]  }
  0x32   :  { %490 = vmatpush1.bf16.xpose.msra.mxu1 %v722_v6  ;;  %543 = vmatpush1.bf16.xpose.msra.mxu0 %v723_v7  ;;  %v753_v29 = vld [vmem:[#allocation5 + $0xc8] ss:$16 sps:$4 sm:$0xff]   ;;  %v754_v30 = vld [vmem:[#allocation5 + $0xe4] ss:$16 sps:$4 sm:$0xff]   ;;  %v756_v31 = vld [vmem:[#allocation5 + $0xec] ss:$16 sps:$4 sm:$0xff]  }
  0x33   :  { %491 = vmatprep.subr.bf16.mxu1 %v724_v8  ;;  %544 = vmatprep.subr.bf16.mxu0 %v726_v9  ;;  %v758_v32 = vld [vmem:[#allocation5 + $0xe0] ss:$16 sps:$4 sm:$0xff]   ;;  %v759_v33 = vld [vmem:[#allocation5 + $0xe8] ss:$16 sps:$4 sm:$0xff]   ;;  %v760_v34 = vld [vmem:[#allocation5 + $0x104] ss:$16 sps:$4 sm:$0xff]   ;;  %v117_v8 = vlaneseq }
  0x34   :  { %519 = vmatprep.mubr.bf16.mxu1 %v810_v26  ;;  %572 = vmatprep.mubr.bf16.mxu0 %v813_v27  ;;  %v762_v35 = vld [vmem:[#allocation5 + $0x10c] ss:$16 sps:$4 sm:$0xff]   ;;  %v764_v36 = vld [vmem:[#allocation5 + $0x100] ss:$16 sps:$4 sm:$0xff]   ;;  %v765_v37 = vld [vmem:[#allocation5 + $0x108] ss:$16 sps:$4 sm:$0xff]  }
  0x35   :  { %v766_v38 = vld [vmem:[#allocation5 + $0x124] ss:$16 sps:$4 sm:$0xff]   ;;  %v768_v39 = vld [vmem:[#allocation5 + $0x12c] ss:$16 sps:$4 sm:$0xff]   ;;  %v770_v40 = vld [vmem:[#allocation5 + $0x120] ss:$16 sps:$4 sm:$0xff]  }
  0x36   :  { %v771_v41 = vld [vmem:[#allocation5 + $0x128] ss:$16 sps:$4 sm:$0xff]   ;;  %v772_v42 = vld [vmem:[#allocation5 + $0x144] ss:$16 sps:$4 sm:$0xff]   ;;  %v774_v43 = vld [vmem:[#allocation5 + $0x14c] ss:$16 sps:$4 sm:$0xff]  }
  0x37   :  { %v776_v44 = vld [vmem:[#allocation5 + $0x140] ss:$16 sps:$4 sm:$0xff]   ;;  %v777_v45 = vld [vmem:[#allocation5 + $0x148] ss:$16 sps:$4 sm:$0xff]   ;;  %v778_v46 = vld [vmem:[#allocation5 + $0x164] ss:$16 sps:$4 sm:$0xff]  }
  0x38   :  { %v780_v47 = vld [vmem:[#allocation5 + $0x16c] ss:$16 sps:$4 sm:$0xff]   ;;  %v782_v48 = vld [vmem:[#allocation5 + $0x160] ss:$16 sps:$4 sm:$0xff]   ;;  %v783_v49 = vld [vmem:[#allocation5 + $0x168] ss:$16 sps:$4 sm:$0xff]  }
  0x39   :  { %v784_v50 = vld [vmem:[#allocation5 + $0x184] ss:$16 sps:$4 sm:$0xff]   ;;  %v786_v51 = vld [vmem:[#allocation5 + $0x18c] ss:$16 sps:$4 sm:$0xff]   ;;  %v788_v52 = vld [vmem:[#allocation5 + $0x180] ss:$16 sps:$4 sm:$0xff]  }
  0x3a   :  { %492 = vmatpush1.bf16.xpose.msra.mxu1 %v728_v10  ;;  %545 = vmatpush1.bf16.xpose.msra.mxu0 %v729_v11  ;;  %v789_v53 = vld [vmem:[#allocation5 + $0x188] ss:$16 sps:$4 sm:$0xff]   ;;  %v790_v54 = vld [vmem:[#allocation5 + $0x1a4] ss:$16 sps:$4 sm:$0xff]   ;;  %v792_v55 = vld [vmem:[#allocation5 + $0x1ac] ss:$16 sps:$4 sm:$0xff]  }
  0x3b   :  { %493 = vmatprep.subr.bf16.mxu1 %v730_v12  ;;  %546 = vmatprep.subr.bf16.mxu0 %v732_v13  ;;  %v794_v56 = vld [vmem:[#allocation5 + $0x1a0] ss:$16 sps:$4 sm:$0xff]   ;;  %v795_v57 = vld [vmem:[#allocation5 + $0x1a8] ss:$16 sps:$4 sm:$0xff]   ;;  %v796_v58 = vld [vmem:[#allocation5 + $0x1c4] ss:$16 sps:$4 sm:$0xff]  }
  0x3c   :  { %v798_v59 = vld [vmem:[#allocation5 + $0x1cc] ss:$16 sps:$4 sm:$0xff]   ;;  %v800_v60 = vld [vmem:[#allocation5 + $0x1c0] ss:$16 sps:$4 sm:$0xff]   ;;  %v801_v61 = vld [vmem:[#allocation5 + $0x1c8] ss:$16 sps:$4 sm:$0xff]  }
  0x3d   :  { %v802_v62 = vld [vmem:[#allocation5 + $0x1e4] ss:$16 sps:$4 sm:$0xff]   ;;  %v804_v63 = vld [vmem:[#allocation5 + $0x1ec] ss:$16 sps:$4 sm:$0xff]   ;;  %v806_v0 = vld [vmem:[#allocation5 + $0x1e0] ss:$16 sps:$4 sm:$0xff]  }
  0x3e   :  { %v807_v1 = vld [vmem:[#allocation5 + $0x1e8] ss:$16 sps:$4 sm:$0xff]   ;;  %v808_v2 = vld [vmem:[#allocation2] ss:$16 sps:$4 sm:$0xff]   ;;  %v814_v4 = vld [vmem:[#allocation2 + $0x24] ss:$16 sps:$4 sm:$0xff]  }
  0x3f   :  { %v811_v3 = vld [vmem:[#allocation2 + $0x8] ss:$16 sps:$4 sm:$0xff]   ;;  %v816_v5 = vld [vmem:[#allocation2 + $0x2c] ss:$16 sps:$4 sm:$0xff]   ;;  %v818_v6 = vld [vmem:[#allocation2 + $0x20] ss:$16 sps:$4 sm:$0xff]  }
  0x40   :  { %v819_v7 = vld [vmem:[#allocation2 + $0x28] ss:$16 sps:$4 sm:$0xff]   ;;  %v118_v9 = vshrl.u32 %v117_v8, 7  ;;  %v115_v11 = vld [vmem:[%s967_s2] sm:$0x3] }
  0x42   :  { %494 = vmatpush1.bf16.xpose.msra.mxu1 %v734_v14  ;;  %547 = vmatpush1.bf16.xpose.msra.mxu0 %v735_v15  ;;  %v119_v10 = vsub.s32 0, %v118_v9  ;;  %v123_v12 = vsub.s32 1, %v118_v9 }
  0x43   :  { %495 = vmatprep.subr.bf16.mxu1 %v736_v16  ;;  %548 = vmatprep.subr.bf16.mxu0 %v738_v17 }
  0x44   :  { %v120_v13 = vrot.slane %v115_v11, %v119_v10  ;;  %v124_v14 = vrot.slane %v115_v11, %v123_v12 }
  0x4a   :  { %496 = vmatpush1.bf16.xpose.msra.mxu1 %v740_v18  ;;  %549 = vmatpush1.bf16.xpose.msra.mxu0 %v741_v19 }
  0x4b   :  { %497 = vmatprep.subr.bf16.mxu1 %v742_v20  ;;  %550 = vmatprep.subr.bf16.mxu0 %v744_v21 }
  0x52   :  { %498 = vmatpush1.bf16.xpose.msra.mxu1 %v746_v22  ;;  %551 = vmatpush1.bf16.xpose.msra.mxu0 %v747_v23 }
  0x53   :  { %499 = vmatprep.subr.bf16.mxu1 %v748_v24  ;;  %552 = vmatprep.subr.bf16.mxu0 %v750_v25 }
  0x5a   :  { %500 = vmatpush1.bf16.xpose.msra.mxu1 %v752_v28  ;;  %553 = vmatpush1.bf16.xpose.msra.mxu0 %v753_v29 }
  0x5b   :  { %501 = vmatprep.subr.bf16.mxu1 %v754_v30  ;;  %554 = vmatprep.subr.bf16.mxu0 %v756_v31 }
  0x62   :  { %502 = vmatpush1.bf16.xpose.msra.mxu1 %v758_v32  ;;  %555 = vmatpush1.bf16.xpose.msra.mxu0 %v759_v33 }
  0x63   :  { %503 = vmatprep.subr.bf16.mxu1 %v760_v34  ;;  %556 = vmatprep.subr.bf16.mxu0 %v762_v35 }
  0x6a   :  { %504 = vmatpush1.bf16.xpose.msra.mxu1 %v764_v36  ;;  %557 = vmatpush1.bf16.xpose.msra.mxu0 %v765_v37 }
  0x6b   :  { %505 = vmatprep.subr.bf16.mxu1 %v766_v38  ;;  %558 = vmatprep.subr.bf16.mxu0 %v768_v39 }
  0x72   :  { %506 = vmatpush1.bf16.xpose.msra.mxu1 %v770_v40  ;;  %559 = vmatpush1.bf16.xpose.msra.mxu0 %v771_v41 }
  0x73   :  { %507 = vmatprep.subr.bf16.mxu1 %v772_v42  ;;  %560 = vmatprep.subr.bf16.mxu0 %v774_v43 }
  0x7a   :  { %508 = vmatpush1.bf16.xpose.msra.mxu1 %v776_v44  ;;  %561 = vmatpush1.bf16.xpose.msra.mxu0 %v777_v45 }
  0x7b   :  { %509 = vmatprep.subr.bf16.mxu1 %v778_v46  ;;  %562 = vmatprep.subr.bf16.mxu0 %v780_v47 }
  0x82   :  { %510 = vmatpush1.bf16.xpose.msra.mxu1 %v782_v48  ;;  %563 = vmatpush1.bf16.xpose.msra.mxu0 %v783_v49 }
  0x83   :  { %511 = vmatprep.subr.bf16.mxu1 %v784_v50  ;;  %564 = vmatprep.subr.bf16.mxu0 %v786_v51 }
  0x8a   :  { %512 = vmatpush1.bf16.xpose.msra.mxu1 %v788_v52  ;;  %565 = vmatpush1.bf16.xpose.msra.mxu0 %v789_v53 }
  0x8b   :  { %513 = vmatprep.subr.bf16.mxu1 %v790_v54  ;;  %566 = vmatprep.subr.bf16.mxu0 %v792_v55 }
  0x92   :  { %514 = vmatpush1.bf16.xpose.msra.mxu1 %v794_v56  ;;  %567 = vmatpush1.bf16.xpose.msra.mxu0 %v795_v57 }
  0x93   :  { %515 = vmatprep.subr.bf16.mxu1 %v796_v58  ;;  %568 = vmatprep.subr.bf16.mxu0 %v798_v59 }
  0x9a   :  { %516 = vmatpush1.bf16.xpose.msra.mxu1 %v800_v60  ;;  %569 = vmatpush1.bf16.xpose.msra.mxu0 %v801_v61 }
  0x9b   :  { %517 = vmatprep.subr.bf16.mxu1 %v802_v62  ;;  %570 = vmatprep.subr.bf16.mxu0 %v804_v63 }
  0xa2   :  { %518 = vmatpush1.bf16.xpose.msra.mxu1 %v806_v0  ;;  %571 = vmatpush1.bf16.xpose.msra.mxu0 %v807_v1 }
  0xa9   :  { %520 = vmatmul.mubr.bf16.vlgmr.msra.gmra.mrb[0].mxu1 %v808_v2  ;;  %573 = vmatmul.mubr.bf16.vlgmr.msra.gmra.mrb[0].mxu0 %v811_v3 }
  0xaa   :  { %529 = vmatprep.mubr.bf16.mxu1 %v814_v4  ;;  %582 = vmatprep.mubr.bf16.mxu0 %v816_v5 }
  0xb1   :  { %530 = vmatmul.mubr.bf16.gmra.mrb[4].mxu1 %v818_v6  ;;  %583 = vmatmul.mubr.bf16.gmra.mrb[4].mxu0 %v819_v7 }
 0x17c   :  { %v521_v15 = vpop.f32.mrb[0].mxu1  ;;  %v574_v16 = vpop.f32.mrb[0].mxu0 }
 0x17d   :  { %v522_v17 = vadd.f32 %v521_v15, %v120_v13  ;;  %v523_v18 = vpop.f32.mrb[1].mxu1  ;;  %v576_v19 = vpop.f32.mrb[1].mxu0 }
 0x17e   :  { %v524_v20 = vadd.f32 %v523_v18, %v124_v14  ;;  %v525_v21 = vpop.f32.mrb[2].mxu1  ;;  %v578_v22 = vpop.f32.mrb[2].mxu0 }
 0x17f   :  { %v575_v23 = vadd.f32 %v574_v16, %v522_v17  ;;  %v526_v24 = vadd.f32 %v525_v21, %v120_v13  ;;  %v527_v25 = vpop.f32.mrb[3].mxu1  ;;  %v580_v26 = vpop.f32.mrb[3].mxu0 }
 0x180   :  { %v577_v27 = vadd.f32 %v576_v19, %v524_v20  ;;  %v528_v28 = vadd.f32 %v527_v25, %v124_v14 }
 0x181   :  { %593 = vst [vmem:[#allocation7] sm:$0xff] %v575_v23  ;;  %v579_v29 = vadd.f32 %v578_v22, %v526_v24 }
 0x182   :  { %594 = vst [vmem:[#allocation7 + $0x8] sm:$0xff] %v577_v27  ;;  %v581_v30 = vadd.f32 %v580_v26, %v528_v28 }
 0x183   :  { %595 = vst [vmem:[#allocation7 + $0x10] sm:$0xff] %v579_v29 }
 0x184   :  { %596 = vst [vmem:[#allocation7 + $0x18] sm:$0xff] %v581_v30  ;;  %v531_v31 = vpop.f32.mrb[4].mxu1  ;;  %v584_v32 = vpop.f32.mrb[4].mxu0 }
 0x185   :  { %v532_v33 = vadd.f32 %v531_v31, %v120_v13  ;;  %v533_v34 = vpop.f32.mrb[5].mxu1  ;;  %v586_v35 = vpop.f32.mrb[5].mxu0 }
 0x186   :  { %v534_v36 = vadd.f32 %v533_v34, %v124_v14  ;;  %v535_v37 = vpop.f32.mrb[6].mxu1  ;;  %v588_v38 = vpop.f32.mrb[6].mxu0 }
 0x187   :  { %v585_v39 = vadd.f32 %v584_v32, %v532_v33  ;;  %v536_v40 = vadd.f32 %v535_v37, %v120_v13  ;;  %v537_v41 = vpop.f32.mrb[7].mxu1  ;;  %v590_v42 = vpop.f32.mrb[7].mxu0 }
 0x188   :  { %v587_v43 = vadd.f32 %v586_v35, %v534_v36  ;;  %v538_v44 = vadd.f32 %v537_v41, %v124_v14 }
 0x189   :  { %597 = vst [vmem:[#allocation7 + $0x20] sm:$0xff] %v585_v39  ;;  %v589_v45 = vadd.f32 %v588_v38, %v536_v40 }
 0x18a   :  { %598 = vst [vmem:[#allocation7 + $0x28] sm:$0xff] %v587_v43  ;;  %v591_v46 = vadd.f32 %v590_v42, %v538_v44 }
 0x18b   :  { %599 = vst [vmem:[#allocation7 + $0x30] sm:$0xff] %v589_v45 }
 0x18c   :  { %600 = vst [vmem:[#allocation7 + $0x38] sm:$0xff] %v591_v46 }
 0x18d   :  { %605 = vsyncadd [#allocation4], 256  ;;  %s896_s2 = smov [#allocation7]  }
 0x18e   :  { %s606_s12 = sshll.u32 %s896_s2, 4  ;;  %s607_s12 = int_to_ptr.vmem [resolvable:$true] %s606_s12 }
 0x18f   :  { %s864_s13 = scalar_lea.vmem %s607_s12, 768  ;;  %s868_s14 = scalar_lea.vmem %s607_s12, 1024 }
 0x190   :  { %p865_p2 = scmp.ne.s32.totalorder %s607_s12, %s864_s13  ;;  %p869_p3 = scmp.lt.s32.totalorder %s607_s12, %s607_s12 }
 0x191   :  { %p870_p4 = scmp.lt.s32.totalorder %s868_s14, %s864_s13 }
 0x193   :  { %p871_p5 = por %p870_p4, %p869_p3 }
 0x195   :  { %p872_p6 = pnand %p871_p5, %p865_p2 }
 0x197   :  { %875 = shalt.err (!%p872_p6)
}
 0x198   :  { %s876_s17 = scalar_lea.hbm %s968_s3, 768 }
 0x199   :  { %p877_p7 = scmp.ne.s32.totalorder %s968_s3, %s876_s17  ;;  %p880_p8 = scmp.lt.u32.totalorder %s876_s17, %s968_s3 }
 0x19b   :  { %p882_p9 = pnand %p880_p8, %p877_p7 }
 0x19d   :  { %885 = shalt.err (!%p882_p9)
}
 0x19e   :  { %612 = dma.vmem_to_hbm [thread:$0]  %s607_s12, 768, %s968_s3, [#allocation4], %s893_s23, %s893_s23, %s894_s24  }
 0x19f   :  { %890 = dma.done.wait [#allocation4], 1024  }
 0x1a0   :  { %891 = vsyncadd [#allocation4], 4294966272 }
 0x1a1   :  { %616 = vsyncpa [#allocation3], 1 }
 0x1a2   :  { %617 = vsyncpa [#allocation6], 1 }
 0x1a3   :  { %618 = vsyncpa [#allocation4], 1 }

</bundles_post_ra>
